<compile_context>
chip_gen: v6e
topology: v6e:2x2x1
jax: 0.10.0
libtpu: 0.0.40
codegen_flags: <defaults>
</compile_context>

<pallas_src>
import jax
import jax.numpy as jnp
from jax.experimental import pallas as pl
from jax.experimental.pallas import tpu as pltpu

NUM_LAYERS = 7
PAD = 128                      # padded feature width (lane-dense)
DIMS = [(3, 25), (25, 25), (25, 25), (25, 25), (25, 24), (24, 24), (24, 3)]


def _round_up(n, m):
    return ((n + m - 1) // m) * m


def mlp7_kernel(x_ref, w_ref, b_ref, o_ref):
    # x_ref: [bm, 128]   activations for this batch tile
    # w_ref: [7, 128, 128]  all weights, zero-padded, layer-major
    # b_ref: [8, 128]       all biases (row i = layer i), zero-padded
    # o_ref: [bm, 128]
    h = x_ref[...]
    for i in range(NUM_LAYERS):
        w = w_ref[i]                         # static slice -> [128, 128]
        b = b_ref[i:i + 1, :]                # static slice -> [1, 128]
        y = jnp.dot(h, w, preferred_element_type=jnp.float32) + b
        h = jnp.maximum(y, 0.0) if i < NUM_LAYERS - 1 else y
    o_ref[...] = h.astype(o_ref.dtype)


def pack_params(params):
    """Pack [(W_t [in,out], b [1,out]) x 7] into zero-padded slabs."""
    w_slab = jnp.zeros((NUM_LAYERS, PAD, PAD), jnp.float32)
    b_slab = jnp.zeros((8, PAD), jnp.float32)     # 8 rows for (8,128) alignment
    for i, (w, b) in enumerate(params):
        fi, fo = w.shape
        w_slab = w_slab.at[i, :fi, :fo].set(w)
        b_slab = b_slab.at[i, :fo].set(b.reshape(-1))
    return w_slab, b_slab


def mlp7_forward(x, w_slab, b_slab, *, block_m=256):
    """x: [B, 3] float32. w_slab: [7,128,128], b_slab: [8,128] (zero-padded)."""
    B = x.shape[0]

    # Batch tile: multiple of 8 sublanes; cap at block_m for large batches.
    bm = min(block_m, _round_up(B, 8))
    B_pad = _round_up(B, bm)

    # Zero-pad activations to [B_pad, 128]; padded lanes/rows stay 0.
    x_pad = jnp.zeros((B_pad, PAD), jnp.float32).at[:B, :3].set(x)

    flops = 2 * B * sum(fi * fo for fi, fo in DIMS)
    bytes_accessed = (x_pad.size + w_slab.size + b_slab.size
                      + B_pad * PAD) * 4

    out = pl.pallas_call(
        mlp7_kernel,
        out_shape=jax.ShapeDtypeStruct((B_pad, PAD), jnp.float32),
        grid_spec=pltpu.PrefetchScalarGridSpec(
            num_scalar_prefetch=0,
            grid=(B_pad // bm,),
            in_specs=[
                pl.BlockSpec((bm, PAD), lambda i: (i, 0)),
                # Constant block index -> parameter slab stays VMEM-resident.
                pl.BlockSpec((NUM_LAYERS, PAD, PAD), lambda i: (0, 0, 0)),
                pl.BlockSpec((8, PAD), lambda i: (0, 0)),
            ],
            out_specs=pl.BlockSpec((bm, PAD), lambda i: (i, 0)),
        ),
        compiler_params=pltpu.CompilerParams(
            dimension_semantics=("parallel",)),
        cost_estimate=pl.CostEstimate(
            flops=flops, transcendentals=0, bytes_accessed=bytes_accessed),
    )(x_pad, w_slab, b_slab)

    return out[:B, :3]


def init_params(key):
    """Deterministic init mimicking nn.Linear (uniform +-1/sqrt(fan_in)).
    Returns logical (unpadded) weights already transposed to [in, out]."""
    params = []
    for (fan_in, fan_out) in DIMS:
        key, kw, kb = jax.random.split(key, 3)
        bound = 1.0 / (fan_in ** 0.5)
        w = jax.random.uniform(kw, (fan_in, fan_out), jnp.float32,
                               minval=-bound, maxval=bound)
        b = jax.random.uniform(kb, (1, fan_out), jnp.float32,
                               minval=-bound, maxval=bound)
        params.append((w, b))
    return params


def mlp7_reference(x, params):
    h = x
    for i, (w, b) in enumerate(params):
        h = h @ w + b
        if i < len(params) - 1:
            h = jnp.maximum(h, 0.0)
    return h


if __name__ == "__main__":
    key = jax.random.PRNGKey(0)
    key, kx = jax.random.split(key)
    B = 8
    x = jax.random.normal(kx, (B, 3), jnp.float32)

    params = init_params(key)
    w_slab, b_slab = pack_params(params)

    out = mlp7_forward(x, w_slab, b_slab)
    out = jax.block_until_ready(out)

    ref = mlp7_reference(x, params)
    assert out.shape == (B, 3)
    assert jnp.allclose(out, ref, atol=1e-5, rtol=1e-5), "mismatch vs reference"

    print("KERNEL_OK")
</pallas_src>

<mosaic_0001>
module attributes {stable_mosaic.version = 11 : i64} {
  func.func @mlp7_kernel(%arg0: i32, %arg1: memref<8x128xf32, #tpu.memory_space<vmem>>, %arg2: memref<7x128x128xf32, #tpu.memory_space<vmem>>, %arg3: memref<8x128xf32, #tpu.memory_space<vmem>>, %arg4: memref<8x128xf32, #tpu.memory_space<vmem>>) attributes {dimension_semantics = [#tpu.dimension_semantics<parallel>], iteration_bounds = array<i64: 1>, scalar_prefetch = 0 : i64, scratch_operands = 0 : i64, tpu.core_type = #tpu.core_type<tc>, window_params = [{transform_indices = @transform_0, window_bounds = array<i64: 8, 128>}, {pipeline_mode = #tpu.pipeline_mode<synchronous>, transform_indices = @transform_1, window_bounds = array<i64: 7, 128, 128>}, {pipeline_mode = #tpu.pipeline_mode<synchronous>, transform_indices = @transform_2, window_bounds = array<i64: 8, 128>}, {transform_indices = @transform_3, window_bounds = array<i64: 8, 128>}]} {
    %c0 = arith.constant 0 : index
    %c0_0 = arith.constant 0 : index
    %0 = vector.load %arg1[%c0, %c0_0] : memref<8x128xf32, #tpu.memory_space<vmem>>, vector<8x128xf32>
    %c0_1 = arith.constant 0 : index
    %c0_2 = arith.constant 0 : index
    %c0_3 = arith.constant 0 : index
    %1 = vector.load %arg2[%c0_1, %c0_2, %c0_3] : memref<7x128x128xf32, #tpu.memory_space<vmem>>, vector<1x128x128xf32>
    %2 = vector.shape_cast %1 : vector<1x128x128xf32> to vector<128x128xf32>
    %c0_4 = arith.constant 0 : index
    %c0_5 = arith.constant 0 : index
    %3 = vector.load %arg3[%c0_4, %c0_5] : memref<8x128xf32, #tpu.memory_space<vmem>>, vector<1x128xf32>
    %cst = arith.constant dense<0.000000e+00> : vector<8x128xf32>
    %4 = tpu.matmul %0, %2, %cst {dimension_numbers = #tpu.dot_dimension_numbers<[1], [0], [0], [1], [0, 0, 1, 1], [], []>} : vector<8x128xf32>, vector<128x128xf32>, vector<8x128xf32> -> vector<8x128xf32>
    %5 = vector.broadcast %3 : vector<1x128xf32> to vector<8x128xf32>
    %6 = arith.addf %4, %5 : vector<8x128xf32>
    %cst_6 = arith.constant 0.000000e+00 : f32
    %7 = vector.broadcast %cst_6 : f32 to vector<8x128xf32>
    %8 = arith.maximumf %6, %7 : vector<8x128xf32>
    %c1 = arith.constant 1 : index
    %c0_7 = arith.constant 0 : index
    %c0_8 = arith.constant 0 : index
    %9 = vector.load %arg2[%c1, %c0_7, %c0_8] : memref<7x128x128xf32, #tpu.memory_space<vmem>>, vector<1x128x128xf32>
    %10 = vector.shape_cast %9 : vector<1x128x128xf32> to vector<128x128xf32>
    %c1_9 = arith.constant 1 : index
    %c0_10 = arith.constant 0 : index
    %11 = vector.load %arg3[%c1_9, %c0_10] : memref<8x128xf32, #tpu.memory_space<vmem>>, vector<1x128xf32>
    %cst_11 = arith.constant dense<0.000000e+00> : vector<8x128xf32>
    %12 = tpu.matmul %8, %10, %cst_11 {dimension_numbers = #tpu.dot_dimension_numbers<[1], [0], [0], [1], [0, 0, 1, 1], [], []>} : vector<8x128xf32>, vector<128x128xf32>, vector<8x128xf32> -> vector<8x128xf32>
    %13 = vector.broadcast %11 : vector<1x128xf32> to vector<8x128xf32>
    %14 = arith.addf %12, %13 : vector<8x128xf32>
    %cst_12 = arith.constant 0.000000e+00 : f32
    %15 = vector.broadcast %cst_12 : f32 to vector<8x128xf32>
    %16 = arith.maximumf %14, %15 : vector<8x128xf32>
    %c2 = arith.constant 2 : index
    %c0_13 = arith.constant 0 : index
    %c0_14 = arith.constant 0 : index
    %17 = vector.load %arg2[%c2, %c0_13, %c0_14] : memref<7x128x128xf32, #tpu.memory_space<vmem>>, vector<1x128x128xf32>
    %18 = vector.shape_cast %17 : vector<1x128x128xf32> to vector<128x128xf32>
    %c2_15 = arith.constant 2 : index
    %c0_16 = arith.constant 0 : index
    %19 = vector.load %arg3[%c2_15, %c0_16] : memref<8x128xf32, #tpu.memory_space<vmem>>, vector<1x128xf32>
    %cst_17 = arith.constant dense<0.000000e+00> : vector<8x128xf32>
    %20 = tpu.matmul %16, %18, %cst_17 {dimension_numbers = #tpu.dot_dimension_numbers<[1], [0], [0], [1], [0, 0, 1, 1], [], []>} : vector<8x128xf32>, vector<128x128xf32>, vector<8x128xf32> -> vector<8x128xf32>
    %21 = vector.broadcast %19 : vector<1x128xf32> to vector<8x128xf32>
    %22 = arith.addf %20, %21 : vector<8x128xf32>
    %cst_18 = arith.constant 0.000000e+00 : f32
    %23 = vector.broadcast %cst_18 : f32 to vector<8x128xf32>
    %24 = arith.maximumf %22, %23 : vector<8x128xf32>
    %c3 = arith.constant 3 : index
    %c0_19 = arith.constant 0 : index
    %c0_20 = arith.constant 0 : index
    %25 = vector.load %arg2[%c3, %c0_19, %c0_20] : memref<7x128x128xf32, #tpu.memory_space<vmem>>, vector<1x128x128xf32>
    %26 = vector.shape_cast %25 : vector<1x128x128xf32> to vector<128x128xf32>
    %c3_21 = arith.constant 3 : index
    %c0_22 = arith.constant 0 : index
    %27 = vector.load %arg3[%c3_21, %c0_22] : memref<8x128xf32, #tpu.memory_space<vmem>>, vector<1x128xf32>
    %cst_23 = arith.constant dense<0.000000e+00> : vector<8x128xf32>
    %28 = tpu.matmul %24, %26, %cst_23 {dimension_numbers = #tpu.dot_dimension_numbers<[1], [0], [0], [1], [0, 0, 1, 1], [], []>} : vector<8x128xf32>, vector<128x128xf32>, vector<8x128xf32> -> vector<8x128xf32>
    %29 = vector.broadcast %27 : vector<1x128xf32> to vector<8x128xf32>
    %30 = arith.addf %28, %29 : vector<8x128xf32>
    %cst_24 = arith.constant 0.000000e+00 : f32
    %31 = vector.broadcast %cst_24 : f32 to vector<8x128xf32>
    %32 = arith.maximumf %30, %31 : vector<8x128xf32>
    %c4 = arith.constant 4 : index
    %c0_25 = arith.constant 0 : index
    %c0_26 = arith.constant 0 : index
    %33 = vector.load %arg2[%c4, %c0_25, %c0_26] : memref<7x128x128xf32, #tpu.memory_space<vmem>>, vector<1x128x128xf32>
    %34 = vector.shape_cast %33 : vector<1x128x128xf32> to vector<128x128xf32>
    %c4_27 = arith.constant 4 : index
    %c0_28 = arith.constant 0 : index
    %35 = vector.load %arg3[%c4_27, %c0_28] : memref<8x128xf32, #tpu.memory_space<vmem>>, vector<1x128xf32>
    %cst_29 = arith.constant dense<0.000000e+00> : vector<8x128xf32>
    %36 = tpu.matmul %32, %34, %cst_29 {dimension_numbers = #tpu.dot_dimension_numbers<[1], [0], [0], [1], [0, 0, 1, 1], [], []>} : vector<8x128xf32>, vector<128x128xf32>, vector<8x128xf32> -> vector<8x128xf32>
    %37 = vector.broadcast %35 : vector<1x128xf32> to vector<8x128xf32>
    %38 = arith.addf %36, %37 : vector<8x128xf32>
    %cst_30 = arith.constant 0.000000e+00 : f32
    %39 = vector.broadcast %cst_30 : f32 to vector<8x128xf32>
    %40 = arith.maximumf %38, %39 : vector<8x128xf32>
    %c5 = arith.constant 5 : index
    %c0_31 = arith.constant 0 : index
    %c0_32 = arith.constant 0 : index
    %41 = vector.load %arg2[%c5, %c0_31, %c0_32] : memref<7x128x128xf32, #tpu.memory_space<vmem>>, vector<1x128x128xf32>
    %42 = vector.shape_cast %41 : vector<1x128x128xf32> to vector<128x128xf32>
    %c5_33 = arith.constant 5 : index
    %c0_34 = arith.constant 0 : index
    %43 = vector.load %arg3[%c5_33, %c0_34] : memref<8x128xf32, #tpu.memory_space<vmem>>, vector<1x128xf32>
    %cst_35 = arith.constant dense<0.000000e+00> : vector<8x128xf32>
    %44 = tpu.matmul %40, %42, %cst_35 {dimension_numbers = #tpu.dot_dimension_numbers<[1], [0], [0], [1], [0, 0, 1, 1], [], []>} : vector<8x128xf32>, vector<128x128xf32>, vector<8x128xf32> -> vector<8x128xf32>
    %45 = vector.broadcast %43 : vector<1x128xf32> to vector<8x128xf32>
    %46 = arith.addf %44, %45 : vector<8x128xf32>
    %cst_36 = arith.constant 0.000000e+00 : f32
    %47 = vector.broadcast %cst_36 : f32 to vector<8x128xf32>
    %48 = arith.maximumf %46, %47 : vector<8x128xf32>
    %c6 = arith.constant 6 : index
    %c0_37 = arith.constant 0 : index
    %c0_38 = arith.constant 0 : index
    %49 = vector.load %arg2[%c6, %c0_37, %c0_38] : memref<7x128x128xf32, #tpu.memory_space<vmem>>, vector<1x128x128xf32>
    %50 = vector.shape_cast %49 : vector<1x128x128xf32> to vector<128x128xf32>
    %c6_39 = arith.constant 6 : index
    %c0_40 = arith.constant 0 : index
    %51 = vector.load %arg3[%c6_39, %c0_40] : memref<8x128xf32, #tpu.memory_space<vmem>>, vector<1x128xf32>
    %cst_41 = arith.constant dense<0.000000e+00> : vector<8x128xf32>
    %52 = tpu.matmul %48, %50, %cst_41 {dimension_numbers = #tpu.dot_dimension_numbers<[1], [0], [0], [1], [0, 0, 1, 1], [], []>} : vector<8x128xf32>, vector<128x128xf32>, vector<8x128xf32> -> vector<8x128xf32>
    %53 = vector.broadcast %51 : vector<1x128xf32> to vector<8x128xf32>
    %54 = arith.addf %52, %53 : vector<8x128xf32>
    %c0_42 = arith.constant 0 : index
    %c0_43 = arith.constant 0 : index
    %55 = vector.load %arg4[%c0_42, %c0_43] : memref<8x128xf32, #tpu.memory_space<vmem>>, vector<8x128xf32>
    tpu.vector_store %arg4[%c0_42, %c0_43], %54 {strides = array<i32>} : memref<8x128xf32, #tpu.memory_space<vmem>>, vector<8x128xf32>,
    return
  }
  func.func @transform_0(%arg0: i32) -> (i32, i32) {
    %c0_i32 = arith.constant 0 : i32
    %c0_i32_0 = arith.constant 0 : i32
    return %arg0, %c0_i32 : i32, i32
  }
  func.func @transform_1(%arg0: i32) -> (i32, i32, i32) {
    %c0_i32 = arith.constant 0 : i32
    %c0_i32_0 = arith.constant 0 : i32
    %c0_i32_1 = arith.constant 0 : i32
    %c0_i32_2 = arith.constant 0 : i32
    return %c0_i32, %c0_i32_0, %c0_i32_1 : i32, i32, i32
  }
  func.func @transform_2(%arg0: i32) -> (i32, i32) {
    %c0_i32 = arith.constant 0 : i32
    %c0_i32_0 = arith.constant 0 : i32
    %c0_i32_1 = arith.constant 0 : i32
    return %c0_i32, %c0_i32_0 : i32, i32
  }
  func.func @transform_3(%arg0: i32) -> (i32, i32) {
    %c0_i32 = arith.constant 0 : i32
    %c0_i32_0 = arith.constant 0 : i32
    return %arg0, %c0_i32 : i32, i32
  }
}

</mosaic_0001>

<bundles_post_ra>
// kernel: tpu_custom_call.1
= control target key start
LH: loop header
LB: loop body
LE: loop exit
PB: predicated region body
PF: predicated region fallthrough
CT: control target
= control target key end

     0   :  { %8 = vsyncpa [#allocation3], 0  ;;  %s1350_s0 = inlined_call_operand.hbm [shape: f32[8,128], index: 0, kind: input, shape index: {}]   ;;  %s1351_s1 = inlined_call_operand.hbm [shape: f32[7,128,128], index: 1, kind: input, shape index: {}]   ;;  %s1352_s2 = inlined_call_operand.hbm [shape: f32[8,128], index: 2, kind: input, shape index: {}]   ;;  %s1353_s3 = inlined_call_operand.hbm [shape: f32[8,128], index: 3, kind: output, shape index: {}]  }
   0x1   :  { %9 = vsyncpa [#allocation6], 0 }
   0x2   :  { %10 = vsyncpa [#allocation4], 0  ;;  %s1184_s12 = smov [#allocation5]  }
   0x3   :  { %s26_s13 = sshll.u32 %s1184_s12, 4  ;;  %s27_s13 = int_to_ptr.vmem [resolvable:$true] %s26_s13 }
   0x4   :  { %s1106_s14 = scalar_lea.vmem %s27_s13, 14336  ;;  %p1111_p1 = scmp.lt.s32.totalorder %s27_s13, %s27_s13 }
   0x5   :  { %p1107_p0 = scmp.ne.s32.totalorder %s27_s13, %s1106_s14  ;;  %p1112_p2 = scmp.lt.s32.totalorder %s1106_s14, %s1106_s14 }
   0x7   :  { %p1113_p3 = por %p1112_p2, %p1111_p1 }
   0x9   :  { %p1114_p4 = pnand %p1113_p3, %p1107_p0 }
   0xb   :  { %1117 = shalt.err (!%p1114_p4)
}
   0xc   :  { %s1185_s15 = smov 128   ;;  %s1186_s16 = smov 8  }
   0xd   :  { %32 = dma.hbm_to_vmem [thread:$0]  %s1351_s1, 14336, %s27_s13, [#allocation6], %s1185_s15, %s1185_s15, %s1186_s16  }
   0xe   :  { %s1187_s19 = smov [#allocation2]   ;;  %s1188_s21 = smov [#allocation7]  }
   0xf   :  { %s17_s20 = sshll.u32 %s1187_s19, 4  ;;  %s39_s22 = sshll.u32 %s1188_s21, 4  ;;  %s18_s20 = int_to_ptr.vmem [resolvable:$true] %s17_s20  ;;  %s40_s22 = int_to_ptr.vmem [resolvable:$true] %s39_s22 }
  0x10   :  { %s1126_s23 = scalar_lea.vmem %s18_s20, 128  ;;  %p1131_p6 = scmp.lt.s32.totalorder %s18_s20, %s18_s20 }
  0x11   :  { %p1127_p5 = scmp.ne.s32.totalorder %s18_s20, %s1126_s23  ;;  %p1132_p7 = scmp.lt.s32.totalorder %s1126_s23, %s1126_s23 }
  0x13   :  { %p1133_p8 = por %p1132_p7, %p1131_p6 }
  0x15   :  { %p1134_p9 = pnand %p1133_p8, %p1127_p5 }
  0x17   :  { %1137 = shalt.err (!%p1134_p9)
}
  0x18   :  { %20 = dma.hbm_to_vmem [thread:$0]  %s1350_s0, 128, %s18_s20, [#allocation3]  }
  0x19   :  { %s1146_s26 = scalar_lea.vmem %s40_s22, 128  ;;  %p1151_p11 = scmp.lt.s32.totalorder %s40_s22, %s40_s22 }
  0x1a   :  { %p1147_p10 = scmp.ne.s32.totalorder %s40_s22, %s1146_s26  ;;  %p1152_p12 = scmp.lt.s32.totalorder %s1146_s26, %s1146_s26 }
  0x1c   :  { %p1153_p13 = por %p1152_p12, %p1151_p11 }
  0x1e   :  { %p1154_p0 = pnand %p1153_p13, %p1147_p10 }
  0x20   :  { %1157 = shalt.err (!%p1154_p0)
}
  0x21   :  { %42 = dma.hbm_to_vmem [thread:$0]  %s1352_s2, 128, %s40_s22, [#allocation6]  }
  0x22   :  { %1178 = dma.done.wait [#allocation3], 128  }
  0x23   :  { %1179 = vsyncadd [#allocation3], 4294967168 }
  0x24   :  { %1180 = dma.done.wait [#allocation6], 14464  }
  0x25   :  { %1181 = vsyncadd [#allocation6], 4294952832  ;;  %v1189_v0 = vmov 0.0   ;;  %vm1190_vm0 = vmmov 0   ;;  %v68_v1 = vld [vmem:[#allocation5 + $0x78] sm:$0xff]  ;;  %v67_v2 = vld [vmem:[#allocation5 + $0x70] sm:$0xff] }
  0x26   :  { %845 = vmatprep.subr.mxu0 %v1189_v0  ;;  %877 = vmatprep.mubr.msk.f32.mxu0 %vm1190_vm0, %v1189_v0  ;;  %v66_v3 = vld [vmem:[#allocation5 + $0x68] sm:$0xff]  ;;  %v65_v4 = vld [vmem:[#allocation5 + $0x60] sm:$0xff]  ;;  %v161_v5 = vld [vmem:[#allocation5 + $0xf8] sm:$0xff]  ;;  %s1191_s0 = smov [#allocation8]  }
  0x27   :  { %880 = vmatprep.subr.mxu1 %v1189_v0  ;;  %912 = vmatprep.mubr.msk.f32.mxu1 %vm1190_vm0, %v1189_v0  ;;  %v64_v6 = vld [vmem:[#allocation5 + $0x58] sm:$0xff]  ;;  %v160_v7 = vld [vmem:[#allocation5 + $0xf0] sm:$0xff]  ;;  %v159_v8 = vld [vmem:[#allocation5 + $0xe8] sm:$0xff]  ;;  %s709_s2 = sshll.u32 %s1191_s0, 4  ;;  %s710_s2 = int_to_ptr.vmem [resolvable:$true] %s709_s2 }
  0x28   :  { %846 = vmatpush3.msra.mxu0 %v68_v1  ;;  %881 = vmatpush3.msra.mxu1 %v161_v5  ;;  %v63_v9 = vld [vmem:[#allocation5 + $0x50] sm:$0xff]  ;;  %v158_v10 = vld [vmem:[#allocation5 + $0xe0] sm:$0xff]  ;;  %v62_v11 = vld [vmem:[#allocation5 + $0x48] sm:$0xff]  ;;  %s1158_s28 = scalar_lea.vmem %s710_s2, 128  ;;  %p1163_p2 = scmp.lt.s32.totalorder %s710_s2, %s710_s2 }
  0x29   :  { %847 = vmatprep.subr.mxu0 %v1189_v0  ;;  %882 = vmatprep.subr.mxu1 %v1189_v0  ;;  %v157_v12 = vld [vmem:[#allocation5 + $0xd8] sm:$0xff]  ;;  %v61_v13 = vld [vmem:[#allocation5 + $0x40] sm:$0xff]  ;;  %v156_v14 = vld [vmem:[#allocation5 + $0xd0] sm:$0xff]  ;;  %p1159_p1 = scmp.ne.s32.totalorder %s710_s2, %s1158_s28  ;;  %p1164_p3 = scmp.lt.s32.totalorder %s1158_s28, %s1158_s28 }
  0x2a   :  { %848 = vmatpush3.msra.mxu0 %v67_v2  ;;  %883 = vmatpush3.msra.mxu1 %v160_v7  ;;  %v60_v15 = vld [vmem:[#allocation5 + $0x38] sm:$0xff]  ;;  %v155_v16 = vld [vmem:[#allocation5 + $0xc8] sm:$0xff]  ;;  %v59_v17 = vld [vmem:[#allocation5 + $0x30] sm:$0xff] }
  0x2b   :  { %849 = vmatprep.subr.mxu0 %v1189_v0  ;;  %884 = vmatprep.subr.mxu1 %v1189_v0  ;;  %v154_v18 = vld [vmem:[#allocation5 + $0xc0] sm:$0xff]  ;;  %v58_v19 = vld [vmem:[#allocation5 + $0x28] sm:$0xff]  ;;  %v153_v20 = vld [vmem:[#allocation5 + $0xb8] sm:$0xff]  ;;  %p1165_p4 = por %p1164_p3, %p1163_p2 }
  0x2c   :  { %850 = vmatpush3.msra.mxu0 %v66_v3  ;;  %885 = vmatpush3.msra.mxu1 %v159_v8  ;;  %v57_v21 = vld [vmem:[#allocation5 + $0x20] sm:$0xff]  ;;  %v152_v22 = vld [vmem:[#allocation5 + $0xb0] sm:$0xff]  ;;  %v56_v23 = vld [vmem:[#allocation5 + $0x18] sm:$0xff] }
  0x2d   :  { %851 = vmatprep.subr.mxu0 %v1189_v0  ;;  %886 = vmatprep.subr.mxu1 %v1189_v0  ;;  %v151_v24 = vld [vmem:[#allocation5 + $0xa8] sm:$0xff]  ;;  %v55_v25 = vld [vmem:[#allocation5 + $0x10] sm:$0xff]  ;;  %v150_v26 = vld [vmem:[#allocation5 + $0xa0] sm:$0xff]  ;;  %p1166_p5 = pnand %p1165_p4, %p1159_p1 }
  0x2e   :  { %852 = vmatpush3.msra.mxu0 %v65_v4  ;;  %887 = vmatpush3.msra.mxu1 %v158_v10  ;;  %v54_v27 = vld [vmem:[#allocation5 + $0x8] sm:$0xff]  ;;  %v149_v28 = vld [vmem:[#allocation5 + $0x98] sm:$0xff]  ;;  %v53_v29 = vld [vmem:[#allocation5] sm:$0xff] }
  0x2f   :  { %853 = vmatprep.subr.mxu0 %v1189_v0  ;;  %888 = vmatprep.subr.mxu1 %v1189_v0  ;;  %v52_v30 = vld [vmem:[#allocation2] sm:$0xff]  ;;  %v148_v31 = vld [vmem:[#allocation5 + $0x90] sm:$0xff]  ;;  %v147_v32 = vld [vmem:[#allocation5 + $0x88] sm:$0xff] }
  0x30   :  { %854 = vmatpush3.msra.mxu0 %v64_v6  ;;  %889 = vmatpush3.msra.mxu1 %v157_v12  ;;  %v146_v33 = vld [vmem:[#allocation5 + $0x80] sm:$0xff]  ;;  %v254_v34 = vld [vmem:[#allocation5 + $0x178] sm:$0xff]  ;;  %v253_v35 = vld [vmem:[#allocation5 + $0x170] sm:$0xff] }
  0x31   :  { %855 = vmatprep.subr.mxu0 %v1189_v0  ;;  %890 = vmatprep.subr.mxu1 %v1189_v0  ;;  %v252_v36 = vld [vmem:[#allocation5 + $0x168] sm:$0xff]  ;;  %v251_v37 = vld [vmem:[#allocation5 + $0x160] sm:$0xff]  ;;  %v250_v38 = vld [vmem:[#allocation5 + $0x158] sm:$0xff] }
  0x32   :  { %856 = vmatpush3.msra.mxu0 %v63_v9  ;;  %891 = vmatpush3.msra.mxu1 %v156_v14  ;;  %v249_v39 = vld [vmem:[#allocation5 + $0x150] sm:$0xff]  ;;  %v248_v40 = vld [vmem:[#allocation5 + $0x148] sm:$0xff]  ;;  %v247_v41 = vld [vmem:[#allocation5 + $0x140] sm:$0xff] }
  0x33   :  { %857 = vmatprep.subr.mxu0 %v1189_v0  ;;  %892 = vmatprep.subr.mxu1 %v1189_v0  ;;  %v246_v42 = vld [vmem:[#allocation5 + $0x138] sm:$0xff]  ;;  %v245_v43 = vld [vmem:[#allocation5 + $0x130] sm:$0xff]  ;;  %v244_v44 = vld [vmem:[#allocation5 + $0x128] sm:$0xff] }
  0x34   :  { %858 = vmatpush3.msra.mxu0 %v62_v11  ;;  %893 = vmatpush3.msra.mxu1 %v155_v16  ;;  %v243_v45 = vld [vmem:[#allocation5 + $0x120] sm:$0xff]  ;;  %v242_v46 = vld [vmem:[#allocation5 + $0x118] sm:$0xff]  ;;  %v241_v52 = vld [vmem:[#allocation5 + $0x110] sm:$0xff] }
  0x35   :  { %859 = vmatprep.subr.mxu0 %v1189_v0  ;;  %894 = vmatprep.subr.mxu1 %v1189_v0  ;;  %v719_v47 = vld [vmem:[#allocation7] ss:$0 sm:$0xff]  ;;  %v240_v53 = vld [vmem:[#allocation5 + $0x108] sm:$0xff]  ;;  %v347_v55 = vld [vmem:[#allocation5 + $0x1f8] sm:$0xff] }
  0x36   :  { %860 = vmatpush3.msra.mxu0 %v61_v13  ;;  %895 = vmatpush3.msra.mxu1 %v154_v18  ;;  %v239_v54 = vld [vmem:[#allocation5 + $0x100] sm:$0xff]  ;;  %v346_v56 = vld [vmem:[#allocation5 + $0x1f0] sm:$0xff]  ;;  %v345_v57 = vld [vmem:[#allocation5 + $0x1e8] sm:$0xff] }
  0x37   :  { %861 = vmatprep.subr.mxu0 %v1189_v0  ;;  %896 = vmatprep.subr.mxu1 %v1189_v0  ;;  %v344_v58 = vld [vmem:[#allocation5 + $0x1e0] sm:$0xff]  ;;  %v343_v59 = vld [vmem:[#allocation5 + $0x1d8] sm:$0xff]  ;;  %v342_v60 = vld [vmem:[#allocation5 + $0x1d0] sm:$0xff] }
  0x38   :  { %862 = vmatpush3.msra.mxu0 %v60_v15  ;;  %897 = vmatpush3.msra.mxu1 %v153_v20  ;;  %v341_v61 = vld [vmem:[#allocation5 + $0x1c8] sm:$0xff]  ;;  %v340_v62 = vld [vmem:[#allocation5 + $0x1c0] sm:$0xff]  ;;  %v339_v63 = vld [vmem:[#allocation5 + $0x1b8] sm:$0xff] }
  0x39   :  { %863 = vmatprep.subr.mxu0 %v1189_v0  ;;  %898 = vmatprep.subr.mxu1 %v1189_v0  ;;  %v338_v1 = vld [vmem:[#allocation5 + $0x1b0] sm:$0xff]  ;;  %v337_v2 = vld [vmem:[#allocation5 + $0x1a8] sm:$0xff]  ;;  %v336_v3 = vld [vmem:[#allocation5 + $0x1a0] sm:$0xff] }
  0x3a   :  { %864 = vmatpush3.msra.mxu0 %v59_v17  ;;  %899 = vmatpush3.msra.mxu1 %v152_v22  ;;  %v335_v4 = vld [vmem:[#allocation5 + $0x198] sm:$0xff]  ;;  %v720_v5 = vld [vmem:[#allocation7 + $0x1] ss:$0 sm:$0xff]  ;;  %v334_v10 = vld [vmem:[#allocation5 + $0x190] sm:$0xff] }
  0x3b   :  { %865 = vmatprep.subr.mxu0 %v1189_v0  ;;  %900 = vmatprep.subr.mxu1 %v1189_v0  ;;  %v333_v11 = vld [vmem:[#allocation5 + $0x188] sm:$0xff]  ;;  %v332_v12 = vld [vmem:[#allocation5 + $0x180] sm:$0xff]  ;;  %v440_v13 = vld [vmem:[#allocation5 + $0x278] sm:$0xff] }
  0x3c   :  { %866 = vmatpush3.msra.mxu0 %v58_v19  ;;  %901 = vmatpush3.msra.mxu1 %v151_v24  ;;  %v439_v14 = vld [vmem:[#allocation5 + $0x270] sm:$0xff]  ;;  %v438_v15 = vld [vmem:[#allocation5 + $0x268] sm:$0xff]  ;;  %v437_v16 = vld [vmem:[#allocation5 + $0x260] sm:$0xff] }
  0x3d   :  { %867 = vmatprep.subr.mxu0 %v1189_v0  ;;  %902 = vmatprep.subr.mxu1 %v1189_v0  ;;  %v436_v17 = vld [vmem:[#allocation5 + $0x258] sm:$0xff]  ;;  %v435_v18 = vld [vmem:[#allocation5 + $0x250] sm:$0xff]  ;;  %v434_v19 = vld [vmem:[#allocation5 + $0x248] sm:$0xff] }
  0x3e   :  { %868 = vmatpush3.msra.mxu0 %v57_v21  ;;  %903 = vmatpush3.msra.mxu1 %v150_v26  ;;  %v433_v20 = vld [vmem:[#allocation5 + $0x240] sm:$0xff]  ;;  %v432_v21 = vld [vmem:[#allocation5 + $0x238] sm:$0xff]  ;;  %v431_v22 = vld [vmem:[#allocation5 + $0x230] sm:$0xff] }
  0x3f   :  { %869 = vmatprep.subr.mxu0 %v1189_v0  ;;  %904 = vmatprep.subr.mxu1 %v1189_v0  ;;  %v429_v24 = vld [vmem:[#allocation5 + $0x220] sm:$0xff] }
  0x40   :  { %870 = vmatpush3.msra.mxu0 %v56_v23  ;;  %905 = vmatpush3.msra.mxu1 %v149_v28  ;;  %v430_v23 = vld [vmem:[#allocation5 + $0x228] sm:$0xff]  ;;  %v721_v26 = vld [vmem:[#allocation7 + $0x2] ss:$0 sm:$0xff] }
  0x41   :  { %871 = vmatprep.subr.mxu0 %v1189_v0  ;;  %906 = vmatprep.subr.mxu1 %v1189_v0 }
  0x42   :  { %872 = vmatpush3.msra.mxu0 %v55_v25  ;;  %907 = vmatpush3.msra.mxu1 %v148_v31  ;;  %v428_v25 = vld [vmem:[#allocation5 + $0x218] sm:$0xff]  ;;  %v427_v31 = vld [vmem:[#allocation5 + $0x210] sm:$0xff] }
  0x43   :  { %873 = vmatprep.subr.mxu0 %v1189_v0  ;;  %908 = vmatprep.subr.mxu1 %v1189_v0 }
  0x44   :  { %874 = vmatpush3.msra.mxu0 %v54_v27  ;;  %909 = vmatpush3.msra.mxu1 %v147_v32  ;;  %v426_v32 = vld [vmem:[#allocation5 + $0x208] sm:$0xff] }
  0x45   :  { %875 = vmatprep.subr.mxu0 %v1189_v0  ;;  %910 = vmatprep.subr.mxu1 %v1189_v0 }
  0x46   :  { %876 = vmatpush3.msra.mxu0 %v53_v29  ;;  %911 = vmatpush3.msra.mxu1 %v146_v33  ;;  %v425_v33 = vld [vmem:[#allocation5 + $0x200] sm:$0xff] }
  0x47   :  { %878 = vmatmul.mubr.f32.vlgmr.msra.gmra.mxu0 %v52_v30  ;;  %915 = vmatprep.subr.mxu0 %v1189_v0 }
  0x48   :  { %947 = vmatprep.mubr.msk.f32.mxu0 %vm1190_vm0, %v1189_v0  ;;  %950 = vmatprep.subr.mxu1 %v1189_v0 }
  0x49   :  { %916 = vmatpush3.msra.mxu0 %v254_v34  ;;  %v533_v34 = vld [vmem:[#allocation5 + $0x2f8] sm:$0xff] }
  0x4a   :  { %917 = vmatprep.subr.mxu0 %v1189_v0 }
  0x4b   :  { %918 = vmatpush3.msra.mxu0 %v253_v35  ;;  %v532_v35 = vld [vmem:[#allocation5 + $0x2f0] sm:$0xff] }
  0x4c   :  { %919 = vmatprep.subr.mxu0 %v1189_v0 }
  0x4d   :  { %920 = vmatpush3.msra.mxu0 %v252_v36  ;;  %v531_v36 = vld [vmem:[#allocation5 + $0x2e8] sm:$0xff] }
  0x4e   :  { %921 = vmatprep.subr.mxu0 %v1189_v0 }
  0x4f   :  { %922 = vmatpush3.msra.mxu0 %v251_v37  ;;  %v530_v37 = vld [vmem:[#allocation5 + $0x2e0] sm:$0xff] }
  0x50   :  { %923 = vmatprep.subr.mxu0 %v1189_v0 }
  0x51   :  { %924 = vmatpush3.msra.mxu0 %v250_v38  ;;  %v529_v38 = vld [vmem:[#allocation5 + $0x2d8] sm:$0xff] }
  0x52   :  { %925 = vmatprep.subr.mxu0 %v1189_v0 }
  0x53   :  { %926 = vmatpush3.msra.mxu0 %v249_v39  ;;  %v528_v39 = vld [vmem:[#allocation5 + $0x2d0] sm:$0xff] }
  0x54   :  { %927 = vmatprep.subr.mxu0 %v1189_v0 }
  0x55   :  { %928 = vmatpush3.msra.mxu0 %v248_v40  ;;  %v527_v40 = vld [vmem:[#allocation5 + $0x2c8] sm:$0xff] }
  0x56   :  { %929 = vmatprep.subr.mxu0 %v1189_v0 }
  0x57   :  { %930 = vmatpush3.msra.mxu0 %v247_v41  ;;  %v526_v41 = vld [vmem:[#allocation5 + $0x2c0] sm:$0xff] }
  0x58   :  { %931 = vmatprep.subr.mxu0 %v1189_v0 }
  0x59   :  { %932 = vmatpush3.msra.mxu0 %v246_v42  ;;  %v525_v42 = vld [vmem:[#allocation5 + $0x2b8] sm:$0xff] }
  0x5a   :  { %933 = vmatprep.subr.mxu0 %v1189_v0 }
  0x5b   :  { %934 = vmatpush3.msra.mxu0 %v245_v43  ;;  %v524_v43 = vld [vmem:[#allocation5 + $0x2b0] sm:$0xff] }
  0x5c   :  { %935 = vmatprep.subr.mxu0 %v1189_v0 }
  0x5d   :  { %936 = vmatpush3.msra.mxu0 %v244_v44  ;;  %v523_v44 = vld [vmem:[#allocation5 + $0x2a8] sm:$0xff] }
  0x5e   :  { %937 = vmatprep.subr.mxu0 %v1189_v0 }
  0x5f   :  { %938 = vmatpush3.msra.mxu0 %v243_v45  ;;  %v522_v45 = vld [vmem:[#allocation5 + $0x2a0] sm:$0xff] }
  0x60   :  { %939 = vmatprep.subr.mxu0 %v1189_v0 }
  0x61   :  { %940 = vmatpush3.msra.mxu0 %v242_v46  ;;  %v521_v46 = vld [vmem:[#allocation5 + $0x298] sm:$0xff] }
  0x62   :  { %941 = vmatprep.subr.mxu0 %v1189_v0 }
  0x63   :  { %942 = vmatpush3.msra.mxu0 %v241_v52  ;;  %v520_v52 = vld [vmem:[#allocation5 + $0x290] sm:$0xff] }
  0x64   :  { %943 = vmatprep.subr.mxu0 %v1189_v0 }
  0x65   :  { %944 = vmatpush3.msra.mxu0 %v240_v53  ;;  %v519_v53 = vld [vmem:[#allocation5 + $0x288] sm:$0xff] }
  0x66   :  { %945 = vmatprep.subr.mxu0 %v1189_v0 }
  0x67   :  { %946 = vmatpush3.msra.mxu0 %v239_v54  ;;  %v518_v54 = vld [vmem:[#allocation5 + $0x280] sm:$0xff] }
  0x68   :  { %985 = vmatprep.subr.mxu0 %v1189_v0 }
 0x107   :  { %v140_v48 = vpop.f32.mrf.mxu0 }
 0x108   :  { %v141_v49 = vadd.f32 %v719_v47, %v140_v48  ;;  %v722_v47 = vld [vmem:[#allocation7 + $0x3] ss:$0 sm:$0xff] }
 0x109   :  { %v879_v50 = vpop.f32.mrf.mxu0 }
 0x10a   :  { %v144_v51 = vmax.f32 %v141_v49, 0.0 }
 0x10c   :  { %913 = vmatmul.mubr.f32.vlgmr.msra.gmra.mxu1 %v144_v51 }
 0x10d   :  { %982 = vmatprep.mubr.msk.f32.mxu1 %vm1190_vm0, %v1189_v0  ;;  %951 = vmatpush3.msra.mxu1 %v347_v55  ;;  %v626_v55 = vld [vmem:[#allocation5 + $0x378] sm:$0xff] }
 0x10e   :  { %952 = vmatprep.subr.mxu1 %v1189_v0 }
 0x10f   :  { %953 = vmatpush3.msra.mxu1 %v346_v56  ;;  %v625_v56 = vld [vmem:[#allocation5 + $0x370] sm:$0xff] }
 0x110   :  { %954 = vmatprep.subr.mxu1 %v1189_v0 }
 0x111   :  { %955 = vmatpush3.msra.mxu1 %v345_v57  ;;  %v624_v57 = vld [vmem:[#allocation5 + $0x368] sm:$0xff] }
 0x112   :  { %956 = vmatprep.subr.mxu1 %v1189_v0 }
 0x113   :  { %957 = vmatpush3.msra.mxu1 %v344_v58  ;;  %v623_v58 = vld [vmem:[#allocation5 + $0x360] sm:$0xff] }
 0x114   :  { %958 = vmatprep.subr.mxu1 %v1189_v0 }
 0x115   :  { %959 = vmatpush3.msra.mxu1 %v343_v59  ;;  %v622_v59 = vld [vmem:[#allocation5 + $0x358] sm:$0xff] }
 0x116   :  { %960 = vmatprep.subr.mxu1 %v1189_v0 }
 0x117   :  { %961 = vmatpush3.msra.mxu1 %v342_v60  ;;  %v621_v60 = vld [vmem:[#allocation5 + $0x350] sm:$0xff] }
 0x118   :  { %962 = vmatprep.subr.mxu1 %v1189_v0 }
 0x119   :  { %963 = vmatpush3.msra.mxu1 %v341_v61  ;;  %v620_v61 = vld [vmem:[#allocation5 + $0x348] sm:$0xff] }
 0x11a   :  { %964 = vmatprep.subr.mxu1 %v1189_v0 }
 0x11b   :  { %965 = vmatpush3.msra.mxu1 %v340_v62  ;;  %v619_v62 = vld [vmem:[#allocation5 + $0x340] sm:$0xff] }
 0x11c   :  { %966 = vmatprep.subr.mxu1 %v1189_v0 }
 0x11d   :  { %967 = vmatpush3.msra.mxu1 %v339_v63  ;;  %v618_v63 = vld [vmem:[#allocation5 + $0x338] sm:$0xff] }
 0x11e   :  { %968 = vmatprep.subr.mxu1 %v1189_v0 }
 0x11f   :  { %969 = vmatpush3.msra.mxu1 %v338_v1  ;;  %v617_v1 = vld [vmem:[#allocation5 + $0x330] sm:$0xff] }
 0x120   :  { %970 = vmatprep.subr.mxu1 %v1189_v0 }
 0x121   :  { %971 = vmatpush3.msra.mxu1 %v337_v2  ;;  %v616_v2 = vld [vmem:[#allocation5 + $0x328] sm:$0xff] }
 0x122   :  { %972 = vmatprep.subr.mxu1 %v1189_v0 }
 0x123   :  { %973 = vmatpush3.msra.mxu1 %v336_v3  ;;  %v615_v3 = vld [vmem:[#allocation5 + $0x320] sm:$0xff] }
 0x124   :  { %974 = vmatprep.subr.mxu1 %v1189_v0 }
 0x125   :  { %975 = vmatpush3.msra.mxu1 %v335_v4  ;;  %v614_v4 = vld [vmem:[#allocation5 + $0x318] sm:$0xff] }
 0x126   :  { %976 = vmatprep.subr.mxu1 %v1189_v0 }
 0x127   :  { %977 = vmatpush3.msra.mxu1 %v334_v10  ;;  %v613_v10 = vld [vmem:[#allocation5 + $0x310] sm:$0xff] }
 0x128   :  { %978 = vmatprep.subr.mxu1 %v1189_v0 }
 0x129   :  { %979 = vmatpush3.msra.mxu1 %v333_v11  ;;  %v612_v11 = vld [vmem:[#allocation5 + $0x308] sm:$0xff] }
 0x12a   :  { %980 = vmatprep.subr.mxu1 %v1189_v0 }
 0x12b   :  { %981 = vmatpush3.msra.mxu1 %v332_v12  ;;  %v611_v12 = vld [vmem:[#allocation5 + $0x300] sm:$0xff] }
 0x12c   :  { %1020 = vmatprep.subr.mxu1 %v1189_v0 }
 0x1cc   :  { %v233_v6 = vpop.f32.mrf.mxu1 }
 0x1cd   :  { %v234_v7 = vadd.f32 %v720_v5, %v233_v6  ;;  %v723_v5 = vld [vmem:[#allocation7 + $0x4] ss:$0 sm:$0xff] }
 0x1ce   :  { %v914_v8 = vpop.f32.mrf.mxu1 }
 0x1cf   :  { %v237_v9 = vmax.f32 %v234_v7, 0.0 }
 0x1d1   :  { %948 = vmatmul.mubr.f32.vlgmr.msra.gmra.mxu0 %v237_v9 }
 0x1d2   :  { %1017 = vmatprep.mubr.msk.f32.mxu0 %vm1190_vm0, %v1189_v0  ;;  %986 = vmatpush3.msra.mxu0 %v440_v13  ;;  %v724_v13 = vld [vmem:[#allocation7 + $0x5] ss:$0 sm:$0xff] }
 0x1d3   :  { %987 = vmatprep.subr.mxu0 %v1189_v0 }
 0x1d4   :  { %988 = vmatpush3.msra.mxu0 %v439_v14 }
 0x1d5   :  { %989 = vmatprep.subr.mxu0 %v1189_v0 }
 0x1d6   :  { %990 = vmatpush3.msra.mxu0 %v438_v15 }
 0x1d7   :  { %991 = vmatprep.subr.mxu0 %v1189_v0 }
 0x1d8   :  { %992 = vmatpush3.msra.mxu0 %v437_v16 }
 0x1d9   :  { %993 = vmatprep.subr.mxu0 %v1189_v0 }
 0x1da   :  { %994 = vmatpush3.msra.mxu0 %v436_v17 }
 0x1db   :  { %995 = vmatprep.subr.mxu0 %v1189_v0 }
 0x1dc   :  { %996 = vmatpush3.msra.mxu0 %v435_v18  ;;  %v725_v18 = vld [vmem:[#allocation7 + $0x6] ss:$0 sm:$0xff] }
 0x1dd   :  { %997 = vmatprep.subr.mxu0 %v1189_v0 }
 0x1de   :  { %998 = vmatpush3.msra.mxu0 %v434_v19 }
 0x1df   :  { %999 = vmatprep.subr.mxu0 %v1189_v0 }
 0x1e0   :  { %1000 = vmatpush3.msra.mxu0 %v433_v20 }
 0x1e1   :  { %1001 = vmatprep.subr.mxu0 %v1189_v0 }
 0x1e2   :  { %1002 = vmatpush3.msra.mxu0 %v432_v21 }
 0x1e3   :  { %1003 = vmatprep.subr.mxu0 %v1189_v0 }
 0x1e4   :  { %1004 = vmatpush3.msra.mxu0 %v431_v22 }
 0x1e5   :  { %1005 = vmatprep.subr.mxu0 %v1189_v0 }
 0x1e6   :  { %1006 = vmatpush3.msra.mxu0 %v430_v23 }
 0x1e7   :  { %1007 = vmatprep.subr.mxu0 %v1189_v0 }
 0x1e8   :  { %1008 = vmatpush3.msra.mxu0 %v429_v24 }
 0x1e9   :  { %1009 = vmatprep.subr.mxu0 %v1189_v0 }
 0x1ea   :  { %1010 = vmatpush3.msra.mxu0 %v428_v25 }
 0x1eb   :  { %1011 = vmatprep.subr.mxu0 %v1189_v0 }
 0x1ec   :  { %1012 = vmatpush3.msra.mxu0 %v427_v31 }
 0x1ed   :  { %1013 = vmatprep.subr.mxu0 %v1189_v0 }
 0x1ee   :  { %1014 = vmatpush3.msra.mxu0 %v426_v32 }
 0x1ef   :  { %1015 = vmatprep.subr.mxu0 %v1189_v0 }
 0x1f0   :  { %1016 = vmatpush3.msra.mxu0 %v425_v33 }
 0x1f1   :  { %1055 = vmatprep.subr.mxu0 %v1189_v0 }
 0x291   :  { %v326_v27 = vpop.f32.mrf.mxu0 }
 0x292   :  { %v327_v28 = vadd.f32 %v721_v26, %v326_v27 }
 0x293   :  { %v949_v29 = vpop.f32.mrf.mxu0 }
 0x294   :  { %v330_v30 = vmax.f32 %v327_v28, 0.0 }
 0x296   :  { %983 = vmatmul.mubr.f32.vlgmr.msra.gmra.mxu1 %v330_v30 }
 0x297   :  { %1052 = vmatprep.mubr.msk.f32.mxu1 %vm1190_vm0, %v1189_v0  ;;  %1021 = vmatpush3.msra.mxu1 %v533_v34 }
 0x298   :  { %1022 = vmatprep.subr.mxu1 %v1189_v0 }
 0x299   :  { %1023 = vmatpush3.msra.mxu1 %v532_v35 }
 0x29a   :  { %1024 = vmatprep.subr.mxu1 %v1189_v0 }
 0x29b   :  { %1025 = vmatpush3.msra.mxu1 %v531_v36 }
 0x29c   :  { %1026 = vmatprep.subr.mxu1 %v1189_v0 }
 0x29d   :  { %1027 = vmatpush3.msra.mxu1 %v530_v37 }
 0x29e   :  { %1028 = vmatprep.subr.mxu1 %v1189_v0 }
 0x29f   :  { %1029 = vmatpush3.msra.mxu1 %v529_v38 }
 0x2a0   :  { %1030 = vmatprep.subr.mxu1 %v1189_v0 }
 0x2a1   :  { %1031 = vmatpush3.msra.mxu1 %v528_v39 }
 0x2a2   :  { %1032 = vmatprep.subr.mxu1 %v1189_v0 }
 0x2a3   :  { %1033 = vmatpush3.msra.mxu1 %v527_v40 }
 0x2a4   :  { %1034 = vmatprep.subr.mxu1 %v1189_v0 }
 0x2a5   :  { %1035 = vmatpush3.msra.mxu1 %v526_v41 }
 0x2a6   :  { %1036 = vmatprep.subr.mxu1 %v1189_v0 }
 0x2a7   :  { %1037 = vmatpush3.msra.mxu1 %v525_v42 }
 0x2a8   :  { %1038 = vmatprep.subr.mxu1 %v1189_v0 }
 0x2a9   :  { %1039 = vmatpush3.msra.mxu1 %v524_v43 }
 0x2aa   :  { %1040 = vmatprep.subr.mxu1 %v1189_v0 }
 0x2ab   :  { %1041 = vmatpush3.msra.mxu1 %v523_v44 }
 0x2ac   :  { %1042 = vmatprep.subr.mxu1 %v1189_v0 }
 0x2ad   :  { %1043 = vmatpush3.msra.mxu1 %v522_v45 }
 0x2ae   :  { %1044 = vmatprep.subr.mxu1 %v1189_v0 }
 0x2af   :  { %1045 = vmatpush3.msra.mxu1 %v521_v46 }
 0x2b0   :  { %1046 = vmatprep.subr.mxu1 %v1189_v0 }
 0x2b1   :  { %1047 = vmatpush3.msra.mxu1 %v520_v52 }
 0x2b2   :  { %1048 = vmatprep.subr.mxu1 %v1189_v0 }
 0x2b3   :  { %1049 = vmatpush3.msra.mxu1 %v519_v53 }
 0x2b4   :  { %1050 = vmatprep.subr.mxu1 %v1189_v0 }
 0x2b5   :  { %1051 = vmatpush3.msra.mxu1 %v518_v54 }
 0x356   :  { %v419_v48 = vpop.f32.mrf.mxu1 }
 0x357   :  { %v420_v49 = vadd.f32 %v722_v47, %v419_v48 }
 0x358   :  { %v984_v50 = vpop.f32.mrf.mxu1 }
 0x359   :  { %v423_v51 = vmax.f32 %v420_v49, 0.0 }
 0x35b   :  { %1018 = vmatmul.mubr.f32.vlgmr.msra.gmra.mxu0 %v423_v51 }
 0x35c   :  { %1087 = vmatprep.mubr.msk.f32.mxu0 %vm1190_vm0, %v1189_v0  ;;  %1056 = vmatpush3.msra.mxu0 %v626_v55 }
 0x35d   :  { %1057 = vmatprep.subr.mxu0 %v1189_v0 }
 0x35e   :  { %1058 = vmatpush3.msra.mxu0 %v625_v56 }
 0x35f   :  { %1059 = vmatprep.subr.mxu0 %v1189_v0 }
 0x360   :  { %1060 = vmatpush3.msra.mxu0 %v624_v57 }
 0x361   :  { %1061 = vmatprep.subr.mxu0 %v1189_v0 }
 0x362   :  { %1062 = vmatpush3.msra.mxu0 %v623_v58 }
 0x363   :  { %1063 = vmatprep.subr.mxu0 %v1189_v0 }
 0x364   :  { %1064 = vmatpush3.msra.mxu0 %v622_v59 }
 0x365   :  { %1065 = vmatprep.subr.mxu0 %v1189_v0 }
 0x366   :  { %1066 = vmatpush3.msra.mxu0 %v621_v60 }
 0x367   :  { %1067 = vmatprep.subr.mxu0 %v1189_v0 }
 0x368   :  { %1068 = vmatpush3.msra.mxu0 %v620_v61 }
 0x369   :  { %1069 = vmatprep.subr.mxu0 %v1189_v0 }
 0x36a   :  { %1070 = vmatpush3.msra.mxu0 %v619_v62 }
 0x36b   :  { %1071 = vmatprep.subr.mxu0 %v1189_v0 }
 0x36c   :  { %1072 = vmatpush3.msra.mxu0 %v618_v63 }
 0x36d   :  { %1073 = vmatprep.subr.mxu0 %v1189_v0 }
 0x36e   :  { %1074 = vmatpush3.msra.mxu0 %v617_v1 }
 0x36f   :  { %1075 = vmatprep.subr.mxu0 %v1189_v0 }
 0x370   :  { %1076 = vmatpush3.msra.mxu0 %v616_v2 }
 0x371   :  { %1077 = vmatprep.subr.mxu0 %v1189_v0 }
 0x372   :  { %1078 = vmatpush3.msra.mxu0 %v615_v3 }
 0x373   :  { %1079 = vmatprep.subr.mxu0 %v1189_v0 }
 0x374   :  { %1080 = vmatpush3.msra.mxu0 %v614_v4 }
 0x375   :  { %1081 = vmatprep.subr.mxu0 %v1189_v0 }
 0x376   :  { %1082 = vmatpush3.msra.mxu0 %v613_v10 }
 0x377   :  { %1083 = vmatprep.subr.mxu0 %v1189_v0 }
 0x378   :  { %1084 = vmatpush3.msra.mxu0 %v612_v11 }
 0x379   :  { %1085 = vmatprep.subr.mxu0 %v1189_v0 }
 0x37a   :  { %1086 = vmatpush3.msra.mxu0 %v611_v12 }
 0x41b   :  { %v512_v6 = vpop.f32.mrf.mxu0 }
 0x41c   :  { %v513_v7 = vadd.f32 %v723_v5, %v512_v6 }
 0x41d   :  { %v1019_v8 = vpop.f32.mrf.mxu0 }
 0x41e   :  { %v516_v9 = vmax.f32 %v513_v7, 0.0 }
 0x420   :  { %1053 = vmatmul.mubr.f32.vlgmr.msra.gmra.mxu1 %v516_v9 }
 0x4e0   :  { %v605_v14 = vpop.f32.mrf.mxu1 }
 0x4e1   :  { %v606_v15 = vadd.f32 %v724_v13, %v605_v14 }
 0x4e2   :  { %v1054_v16 = vpop.f32.mrf.mxu1 }
 0x4e3   :  { %v609_v17 = vmax.f32 %v606_v15, 0.0 }
 0x4e5   :  { %1088 = vmatmul.mubr.f32.vlgmr.msra.gmra.mxu0 %v609_v17 }
 0x5a5   :  { %v698_v19 = vpop.f32.mrf.mxu0 }
 0x5a6   :  { %v699_v20 = vadd.f32 %v725_v18, %v698_v19 }
 0x5a7   :  { %v1089_v21 = vpop.f32.mrf.mxu0 }
 0x5a8   :  { %702 = vst [vmem:[#allocation8] sm:$0xff] %v699_v20 }
 0x5a9   :  { %1169 = shalt.err (!%p1166_p5)
}
 0x5aa   :  { %712 = dma.vmem_to_hbm [thread:$0]  %s710_s2, 128, %s1353_s3, [#allocation4]  }
 0x5ab   :  { %1182 = dma.done.wait [#allocation4], 128  }
 0x5ac   :  { %1183 = vsyncadd [#allocation4], 4294967168 }
 0x5ad   :  { %716 = vsyncpa [#allocation3], 1 }
 0x5ae   :  { %717 = vsyncpa [#allocation6], 1 }
 0x5af   :  { %718 = vsyncpa [#allocation4], 1 }

</bundles_post_ra>
